<compile_context>
chip_gen: v5e
topology: v5e:2x2
jax: 0.10.0
libtpu: 0.0.40
codegen_flags: <defaults>
</compile_context>

<pallas_src>
import functools
from typing import NamedTuple, Optional

import jax
import jax.numpy as jnp
from jax.experimental import pallas as pl
from jax.experimental.pallas import tpu as pltpu


def _round_up(a, m):
    return ((a + m - 1) // m) * m


def _cdiv(a, b):
    return (a + b - 1) // b


def _pick_tile(dim, hint, align):
    """Tile size for `dim`: the full dim if dim < align (exact block),
    otherwise a multiple of `align`, <= min(hint, dim), chosen so that the
    ragged remainder (padding / masked waste) is small."""
    if dim < align:
        return dim
    cap = min(hint, (dim // align) * align)
    n = _cdiv(dim, cap)
    return min(cap, _round_up(_cdiv(dim, n), align))


def _linear_clamp_kernel(x_ref, w_ref, b_ref, o_ref, *acc_scratch,
                         min_value, max_value):
    # f32 outputs: the K-resident output block itself is the accumulator.
    # Narrower outputs: an f32 VMEM scratch accumulator is supplied.
    acc_ref = acc_scratch[0] if acc_scratch else o_ref
    k = pl.program_id(2)

    @pl.when(k == 0)
    def _():
        acc_ref[...] = jnp.zeros_like(acc_ref)

    # (tm, tk) @ (tk, tn) -> (tm, tn) MXU partial product, f32 accumulation.
    acc_ref[...] += jnp.dot(x_ref[...], w_ref[...],
                            preferred_element_type=jnp.float32)

    @pl.when(k == pl.num_programs(2) - 1)
    def _():
        out = acc_ref[...] + b_ref[...].astype(jnp.float32)
        out = jnp.clip(out, min_value, max_value)   # clamp_min then clamp_max
        o_ref[...] = out.astype(o_ref.dtype)


class LinearClampParams(NamedTuple):
    wt: jax.Array      # (Kp, Np) K-major, zero-padded weight (prepared once)
    bias: jax.Array    # (1, Np) zero-padded bias
    out_features: int
    in_features: int
    tn: int
    tk: int
    min_value: float
    max_value: float


def prepare_linear_clamp_params(weight, bias, min_value=-0.5, max_value=0.5,
                                tn=512, tk=512,
                                compute_dtype: Optional[jnp.dtype] = None):
    """One-time parameter prep, off the per-call path.

    weight: PyTorch-layout (out_features, in_features); bias: (out_features,).
    Transposes to K-major and zero-pads to tile multiples so every per-call
    weight DMA block is exact (no ragged weight reads).
    """
    N, K = weight.shape

    # Reduction axis: always padded to a 128 multiple (correctness-neutral
    # zeros), with tk chosen to minimize padded K traffic.
    K128 = _round_up(K, 128)
    tk = _pick_tile(K128, tk, 128)
    Kp = _round_up(K128, tk)

    # Output-feature axis: lane-dense 128-multiple tiles when N >= 128,
    # otherwise the full (narrow) dim.
    tn = _pick_tile(N, tn, 128)
    Np = _round_up(N, tn)

    w_dtype = compute_dtype if compute_dtype is not None else weight.dtype
    wt = jnp.zeros((Kp, Np), w_dtype).at[:K, :N].set(weight.T.astype(w_dtype))
    b = jnp.zeros((1, Np), bias.dtype).at[0, :N].set(bias)
    return LinearClampParams(wt=wt, bias=b, out_features=N, in_features=K,
                             tn=tn, tk=tk,
                             min_value=float(min_value),
                             max_value=float(max_value))


def linear_clamp(x, params: LinearClampParams, tm=256):
    """x: (B, in_features) -> clip(x @ W.T + b, min, max) of shape (B, out_features)."""
    B, K = x.shape
    assert K == params.in_features, (K, params.in_features)
    N, tn, tk = params.out_features, params.tn, params.tk
    Kp = params.wt.shape[0]

    # M tile: sublane-aligned, never larger than B (ragged edge block handled
    # by Pallas' masked stores -> no x padding on M, no output slicing).
    tm = _pick_tile(B, tm, 8)
    grid_m, grid_n = _cdiv(B, tm), _cdiv(N, tn)
    # v7x has 2 TensorCores sharded over the "parallel" axes: make sure the
    # parallel grid has >= 2 blocks when the batch is large enough to split.
    if grid_m * grid_n == 1 and B >= 16:
        tm = _round_up(_cdiv(B, 2), 8)
        grid_m = _cdiv(B, tm)

    # Only the contraction axis needs zero padding for correctness; this is a
    # no-op when K is already tile-aligned.
    xp = x if Kp == K else jnp.pad(x, ((0, 0), (0, Kp - K)))
    if xp.dtype != params.wt.dtype:
        xp = xp.astype(params.wt.dtype)   # optional bf16 compute path

    # NOTE: output dtype follows x (PyTorch Linear requires matching dtypes;
    # mixed-dtype promotion is not reproduced here).
    out_dtype = x.dtype
    grid = (grid_m, grid_n, Kp // tk)
    scratch = ([] if out_dtype == jnp.float32
               else [pltpu.VMEM((tm, tn), jnp.float32)])

    kernel = functools.partial(_linear_clamp_kernel,
                               min_value=params.min_value,
                               max_value=params.max_value)

    return pl.pallas_call(
        kernel,
        out_shape=jax.ShapeDtypeStruct((B, N), out_dtype),
        grid=grid,
        in_specs=[
            pl.BlockSpec((tm, tk), lambda i, j, k: (i, k)),   # x tile
            pl.BlockSpec((tk, tn), lambda i, j, k: (k, j)),   # weight tile (K-major)
            pl.BlockSpec((1, tn), lambda i, j, k: (0, j)),    # bias tile
        ],
        out_specs=pl.BlockSpec((tm, tn), lambda i, j, k: (i, j)),
        scratch_shapes=scratch,
        compiler_params=pltpu.CompilerParams(
            dimension_semantics=("parallel", "parallel", "arbitrary"),
        ),
    )(xp, params.wt, params.bias)


if __name__ == "__main__":
    key = jax.random.PRNGKey(0)

    # ---- Module-sized check: Linear(6 -> 8), clamp to [-0.5, 0.5] ----------
    in_features, out_features, batch = 6, 8, 2
    kx, kw, kb, kx2, kw2, kb2 = jax.random.split(key, 6)

    bound = 1.0 / jnp.sqrt(jnp.float32(in_features))
    weight = jax.random.uniform(kw, (out_features, in_features), jnp.float32,
                                -bound, bound)
    bias = jax.random.uniform(kb, (out_features,), jnp.float32, -bound, bound)
    x1 = jax.random.normal(kx, (batch, in_features), jnp.float32)

    params = prepare_linear_clamp_params(weight, bias, -0.5, 0.5)
    out = jax.block_until_ready(linear_clamp(x1, params))
    ref = jnp.clip(x1 @ weight.T + bias, -0.5, 0.5)
    assert out.shape == (batch, out_features)
    assert jnp.allclose(out, ref, atol=1e-5, rtol=1e-5)

    # ---- Larger misaligned check: exercises the tiled / ragged-edge path ----
    B2, K2, N2 = 300, 600, 700
    bound2 = 1.0 / jnp.sqrt(jnp.float32(K2))
    w2 = jax.random.uniform(kw2, (N2, K2), jnp.float32, -bound2, bound2)
    b2 = jax.random.uniform(kb2, (N2,), jnp.float32, -bound2, bound2)
    x2 = jax.random.normal(kx2, (B2, K2), jnp.float32)

    params2 = prepare_linear_clamp_params(w2, b2, -0.5, 0.5)
    out2 = jax.block_until_ready(linear_clamp(x2, params2))
    ref2 = jnp.clip(x2 @ w2.T + b2, -0.5, 0.5)
    assert out2.shape == (B2, N2)
    assert jnp.allclose(out2, ref2, atol=1e-4, rtol=1e-4)

    print("KERNEL_OK")
</pallas_src>

<mosaic_0001>
module attributes {stable_mosaic.version = 11 : i64} {
  func.func @_linear_clamp_kernel(%arg0: i32, %arg1: i32, %arg2: i32, %arg3: memref<2x128xf32, #tpu.memory_space<vmem>>, %arg4: memref<128x8xf32, #tpu.memory_space<vmem>>, %arg5: memref<1x8xf32, #tpu.memory_space<vmem>>, %arg6: memref<2x8xf32, #tpu.memory_space<vmem>>) attributes {dimension_semantics = [#tpu.dimension_semantics<parallel>, #tpu.dimension_semantics<parallel>, #tpu.dimension_semantics<arbitrary>], iteration_bounds = array<i64: 1, 1, 1>, scalar_prefetch = 0 : i64, scratch_operands = 0 : i64, tpu.core_type = #tpu.core_type<tc>, window_params = [{transform_indices = @transform_0, window_bounds = array<i64: 2, 128>}, {transform_indices = @transform_1, window_bounds = array<i64: 128, 8>}, {transform_indices = @transform_2, window_bounds = array<i64: 1, 8>}, {transform_indices = @transform_3, window_bounds = array<i64: 2, 8>}]} {
    %c0_i32 = arith.constant 0 : i32
    %0 = arith.cmpi eq, %arg2, %c0_i32 : i32
    %1 = arith.extui %0 : i1 to i32
    %c0_i32_0 = arith.constant 0 : i32
    %2 = arith.cmpi ne, %1, %c0_i32_0 : i32
    scf.if %2 {
      %cst_10 = arith.constant 0.000000e+00 : f32
      %12 = vector.broadcast %cst_10 : f32 to vector<2x8xf32>
      %c0_11 = arith.constant 0 : index
      %c0_12 = arith.constant 0 : index
      %13 = vector.load %arg6[%c0_11, %c0_12] : memref<2x8xf32, #tpu.memory_space<vmem>>, vector<2x8xf32>
      tpu.vector_store %arg6[%c0_11, %c0_12], %12 {strides = array<i32>} : memref<2x8xf32, #tpu.memory_space<vmem>>, vector<2x8xf32>,
    } else {
    }
    %c0 = arith.constant 0 : index
    %c0_1 = arith.constant 0 : index
    %3 = vector.load %arg6[%c0, %c0_1] : memref<2x8xf32, #tpu.memory_space<vmem>>, vector<2x8xf32>
    %c0_2 = arith.constant 0 : index
    %c0_3 = arith.constant 0 : index
    %4 = vector.load %arg3[%c0_2, %c0_3] : memref<2x128xf32, #tpu.memory_space<vmem>>, vector<2x128xf32>
    %c0_4 = arith.constant 0 : index
    %c0_5 = arith.constant 0 : index
    %5 = vector.load %arg4[%c0_4, %c0_5] : memref<128x8xf32, #tpu.memory_space<vmem>>, vector<128x8xf32>
    %cst = arith.constant dense<0.000000e+00> : vector<2x8xf32>
    %6 = tpu.matmul %4, %5, %cst {dimension_numbers = #tpu.dot_dimension_numbers<[1], [0], [0], [1], [0, 0, 1, 1], [], []>} : vector<2x128xf32>, vector<128x8xf32>, vector<2x8xf32> -> vector<2x8xf32>
    %7 = arith.addf %3, %6 : vector<2x8xf32>
    %c0_6 = arith.constant 0 : index
    %c0_7 = arith.constant 0 : index
    %8 = vector.load %arg6[%c0_6, %c0_7] : memref<2x8xf32, #tpu.memory_space<vmem>>, vector<2x8xf32>
    tpu.vector_store %arg6[%c0_6, %c0_7], %7 {strides = array<i32>} : memref<2x8xf32, #tpu.memory_space<vmem>>, vector<2x8xf32>,
    %c0_i32_8 = arith.constant 0 : i32
    %9 = arith.cmpi eq, %arg2, %c0_i32_8 : i32
    %10 = arith.extui %9 : i1 to i32
    %c0_i32_9 = arith.constant 0 : i32
    %11 = arith.cmpi ne, %10, %c0_i32_9 : i32
    scf.if %11 {
      %c0_10 = arith.constant 0 : index
      %c0_11 = arith.constant 0 : index
      %12 = vector.load %arg6[%c0_10, %c0_11] : memref<2x8xf32, #tpu.memory_space<vmem>>, vector<2x8xf32>
      %c0_12 = arith.constant 0 : index
      %c0_13 = arith.constant 0 : index
      %13 = vector.load %arg5[%c0_12, %c0_13] : memref<1x8xf32, #tpu.memory_space<vmem>>, vector<1x8xf32>
      %14 = vector.broadcast %13 : vector<1x8xf32> to vector<2x8xf32>
      %15 = arith.addf %12, %14 : vector<2x8xf32>
      %cst_14 = arith.constant -5.000000e-01 : f32
      %cst_15 = arith.constant 5.000000e-01 : f32
      %16 = vector.broadcast %cst_14 : f32 to vector<2x8xf32>
      %17 = arith.maximumf %16, %15 : vector<2x8xf32>
      %18 = vector.broadcast %cst_15 : f32 to vector<2x8xf32>
      %19 = arith.minimumf %18, %17 : vector<2x8xf32>
      %c0_16 = arith.constant 0 : index
      %c0_17 = arith.constant 0 : index
      %20 = vector.load %arg6[%c0_16, %c0_17] : memref<2x8xf32, #tpu.memory_space<vmem>>, vector<2x8xf32>
      tpu.vector_store %arg6[%c0_16, %c0_17], %19 {strides = array<i32>} : memref<2x8xf32, #tpu.memory_space<vmem>>, vector<2x8xf32>,
    } else {
    }
    return
  }
  func.func @transform_0(%arg0: i32, %arg1: i32, %arg2: i32) -> (i32, i32) {
    %c0_i32 = arith.constant 0 : i32
    return %arg0, %arg2 : i32, i32
  }
  func.func @transform_1(%arg0: i32, %arg1: i32, %arg2: i32) -> (i32, i32) {
    %c0_i32 = arith.constant 0 : i32
    return %arg2, %arg1 : i32, i32
  }
  func.func @transform_2(%arg0: i32, %arg1: i32, %arg2: i32) -> (i32, i32) {
    %c0_i32 = arith.constant 0 : i32
    %c0_i32_0 = arith.constant 0 : i32
    return %c0_i32, %arg1 : i32, i32
  }
  func.func @transform_3(%arg0: i32, %arg1: i32, %arg2: i32) -> (i32, i32) {
    %c0_i32 = arith.constant 0 : i32
    return %arg0, %arg1 : i32, i32
  }
}

</mosaic_0001>

<bundles_post_ra>
// kernel: tpu_custom_call.1
= control target key start
LH: loop header
LB: loop body
LE: loop exit
PB: predicated region body
PF: predicated region fallthrough
CT: control target
= control target key end

     0   :  { %vm19_vm0 = vcmask 58368   ;;  %v120_v2 = vmov 0.0   ;;  %s202_s0 = inlined_call_operand.vmem [shape: f32[2,128], index: 0, kind: input, shape index: {}]   ;;  %s203_s1 = inlined_call_operand.vmem [shape: f32[128,8], index: 1, kind: input, shape index: {}]   ;;  %s204_s2 = inlined_call_operand.vmem [shape: f32[1,8], index: 2, kind: input, shape index: {}]   ;;  %s205_s3 = inlined_call_operand.hbm [shape: f32[2,8], index: 3, kind: output, shape index: {}]  }
   0x1   :  { %v38_v0 = vld [vmem:[%s203_s1 + $0x78] sm:$0xff]  ;;  %v37_v1 = vld [vmem:[%s203_s1 + $0x70] sm:$0xff]  ;;  %20 = vst.msk [vmem:[#allocation2] sm:$0x3] %vm19_vm0, %v120_v2  ;;  %v36_v3 = vld [vmem:[%s203_s1 + $0x68] sm:$0xff] }
   0x2   :  { %39 = vmatpush.msra.mxu0 %v38_v0  ;;  %v35_v4 = vld [vmem:[%s203_s1 + $0x60] sm:$0xff] }
   0x4   :  { %40 = vmatpush.msra.mxu0 %v37_v1 }
   0x6   :  { %41 = vmatpush.msra.mxu0 %v36_v3 }
   0x7   :  { %8 = vsyncpa [#allocation3], 0  ;;  %v34_v5 = vld [vmem:[%s203_s1 + $0x58] sm:$0xff]  ;;  %v33_v6 = vld [vmem:[%s203_s1 + $0x50] sm:$0xff]  ;;  %s121_s21 = smov [#allocation2]   ;;  %s81_s24 = sshll.u32 %s205_s3, 4  ;;  %s82_s24 = int_to_ptr.hbm [resolvable:$true] %s81_s24 }
   0x8   :  { %42 = vmatpush.msra.mxu0 %v35_v4  ;;  %v32_v7 = vld [vmem:[%s203_s1 + $0x48] sm:$0xff]  ;;  %v31_v8 = vld [vmem:[%s203_s1 + $0x40] sm:$0xff]  ;;  %v30_v9 = vld [vmem:[%s203_s1 + $0x38] sm:$0xff]  ;;  %s79_s22 = sshll.u32 %s121_s21, 4  ;;  %s80_s22 = int_to_ptr.vmem [resolvable:$true] %s79_s22 }
   0x9   :  { %v29_v10 = vld [vmem:[%s203_s1 + $0x30] sm:$0xff]  ;;  %v28_v11 = vld [vmem:[%s203_s1 + $0x28] sm:$0xff]  ;;  %v27_v12 = vld [vmem:[%s203_s1 + $0x20] sm:$0xff] }
   0xa   :  { %43 = vmatpush.msra.mxu0 %v34_v5  ;;  %v26_v13 = vld [vmem:[%s203_s1 + $0x18] sm:$0xff]  ;;  %v25_v14 = vld [vmem:[%s203_s1 + $0x10] sm:$0xff]  ;;  %v24_v15 = vld [vmem:[%s203_s1 + $0x8] sm:$0xff] }
   0xb   :  { %v23_v16 = vld [vmem:[%s203_s1] sm:$0xff] }
   0xc   :  { %44 = vmatpush.msra.mxu0 %v33_v6  ;;  %v22_v17 = vld [vmem:[%s202_s0] sm:$0x3] }
   0xd   :  { %v21_v18 = vld [vmem:[#allocation2] sm:$0x3] }
   0xe   :  { %45 = vmatpush.msra.mxu0 %v32_v7  ;;  %v93_v21 = vld [vmem:[%s204_s2] ss:$0 sm:$0xff] }
  0x10   :  { %46 = vmatpush.msra.mxu0 %v31_v8 }
  0x12   :  { %47 = vmatpush.msra.mxu0 %v30_v9 }
  0x14   :  { %48 = vmatpush.msra.mxu0 %v29_v10 }
  0x16   :  { %49 = vmatpush.msra.mxu0 %v28_v11 }
  0x18   :  { %50 = vmatpush.msra.mxu0 %v27_v12 }
  0x1a   :  { %51 = vmatpush.msra.mxu0 %v26_v13 }
  0x1c   :  { %52 = vmatpush.msra.mxu0 %v25_v14 }
  0x1e   :  { %53 = vmatpush.msra.mxu0 %v24_v15 }
  0x20   :  { %54 = vmatpush.msra.mxu0 %v23_v16 }
  0x21   :  { %55 = vmatmul.f32.vlgmr.msra.gmra.mxu0 %v22_v17 }
  0x9e   :  { %v56_v19 = vpop.f32.mrf.mxu0 }
  0x9f   :  { %v59_v20 = vadd.f32 %v56_v19, %v21_v18 }
  0xa1   :  { %61 = vst.msk [vmem:[#allocation2] sm:$0x3] %vm19_vm0, %v59_v20 }
  0xa8   :  { %v65_v22 = vld [vmem:[#allocation2] sm:$0x3] }
  0xa9   :  { %v70_v23 = vadd.f32 %v93_v21, %v65_v22 }
  0xab   :  { %v90_v24 = vclamps-f32 %v70_v23, 0.5 }
  0xad   :  { %73 = vst.msk [vmem:[#allocation2] sm:$0x3] %vm19_vm0, %v90_v24 }
  0xae   :  { %84 = dma.vmem_to_hbm [thread:$0]  %s80_s22, 32, %s82_s24, [#allocation3]  }
  0xaf   :  { %118 = dma.done.wait [#allocation3], 32  }
  0xb0   :  { %119 = vsyncadd [#allocation3], 4294967264 }
  0xb1   :  { %89 = vsyncpa [#allocation3], 1 }

</bundles_post_ra>
